<compile_context>
chip_gen: v7x
topology: tpu7x:2x2x1
jax: 0.10.0
libtpu: 0.0.40
codegen_flags: <defaults>
</compile_context>

<pallas_src>
import functools

import jax
import jax.numpy as jnp
from jax.experimental import pallas as pl
from jax.experimental.pallas import tpu as pltpu

_TILE_COLS = 512
_VMEM_LIMIT = 32 * 1024 * 1024


# ---------------------------------------------------------------------------
# Kernels
# ---------------------------------------------------------------------------

def _conv_stats_kernel(xcol_ref, w_ref, y_ref, s1_ref, s2_ref):
    """Pass 1: fused-K conv as one MXU matmul + per-channel sum / sumsq.

    xcol_ref: (K*Cin, T)   im2col tile (columns = flattened N*H*W positions)
    w_ref:    (Cout, K*Cin)
    y_ref:    (Cout, T)    conv output tile (lane-dense last dim)
    s1_ref:   (Cout, 1)    running sum    (accumulated across the grid)
    s2_ref:   (Cout, 1)    running sumsq  (accumulated across the grid)
    """
    y = jnp.dot(w_ref[...], xcol_ref[...], preferred_element_type=jnp.float32)
    y_ref[...] = y

    @pl.when(pl.program_id(0) == 0)
    def _():
        s1_ref[...] = jnp.zeros_like(s1_ref)
        s2_ref[...] = jnp.zeros_like(s2_ref)

    s1_ref[...] += jnp.sum(y, axis=1, keepdims=True)
    s2_ref[...] += jnp.sum(y * y, axis=1, keepdims=True)


def _bn_elu_kernel(y_ref, scale_ref, shift_ref, o_ref):
    """Pass 2: folded BatchNorm (scale/shift) + ELU(alpha=1) on lane-dense tiles."""
    z = y_ref[...] * scale_ref[...] + shift_ref[...]
    o_ref[...] = jnp.where(z > 0, z, jnp.exp(jnp.minimum(z, 0.0)) - 1.0)


# ---------------------------------------------------------------------------
# TC_Block (conv -> BN(train stats) -> ELU), channels-leading in/out
# ---------------------------------------------------------------------------

@functools.partial(jax.jit, static_argnames=("dilation", "tile_cols"))
def tc_block_pallas(x_cl, weight, gamma, beta, *, dilation, eps=1e-5,
                    tile_cols=_TILE_COLS):
    """x_cl: (Cin, N, H, W) channels-leading.  Returns (Cout, N, H, W).

    weight: PyTorch Conv2d weight (Cout, Cin, 1, K).  The conv bias is omitted
    on purpose: with training-mode BN it cancels exactly in (y - mean).
    """
    Cin, N, H, W = x_cl.shape
    Cout, _, _, K = weight.shape
    pad = (K // 2) * dilation
    KC = K * Cin
    L = N * H * W
    T = tile_cols
    Lp = ((L + T - 1) // T) * T          # zero cols contribute 0 to sum/sumsq

    # --- wrapper glue: im2col over the K width-taps (XLA) ------------------
    x_pad = jnp.pad(x_cl.astype(jnp.float32),
                    ((0, 0), (0, 0), (0, 0), (pad, pad)))
    taps = [x_pad[:, :, :, k * dilation:k * dilation + W] for k in range(K)]
    xcol = jnp.stack(taps, axis=0).reshape(KC, L)      # row index = k*Cin + cin
    if Lp != L:
        xcol = jnp.pad(xcol, ((0, 0), (0, Lp - L)))

    # (Cout, K, Cin) -> (Cout, K*Cin), matching xcol row ordering.
    w2 = jnp.transpose(weight[:, :, 0, :], (0, 2, 1)).reshape(Cout, KC)
    w2 = w2.astype(jnp.float32)

    grid = (Lp // T,)

    # --- pass 1: conv + per-channel sum / sumsq ------------------------------
    y, s1, s2 = pl.pallas_call(
        _conv_stats_kernel,
        out_shape=(
            jax.ShapeDtypeStruct((Cout, Lp), jnp.float32),
            jax.ShapeDtypeStruct((Cout, 1), jnp.float32),
            jax.ShapeDtypeStruct((Cout, 1), jnp.float32),
        ),
        grid=grid,
        in_specs=[
            pl.BlockSpec((KC, T), lambda j: (0, j)),
            pl.BlockSpec((Cout, KC), lambda j: (0, 0)),
        ],
        out_specs=(
            pl.BlockSpec((Cout, T), lambda j: (0, j)),
            pl.BlockSpec((Cout, 1), lambda j: (0, 0)),
            pl.BlockSpec((Cout, 1), lambda j: (0, 0)),
        ),
        compiler_params=pltpu.CompilerParams(
            dimension_semantics=("arbitrary",),   # sum/sumsq accumulate over j
            vmem_limit_bytes=_VMEM_LIMIT,
        ),
    )(xcol, w2)

    # --- fold BN into a single scale/shift (tiny per-channel XLA math) ------
    cnt = jnp.float32(L)
    mean = s1[:, 0] / cnt
    var = jnp.maximum(s2[:, 0] / cnt - mean * mean, 0.0)   # biased variance
    scale = gamma.astype(jnp.float32) * jax.lax.rsqrt(var + eps)
    shift = beta.astype(jnp.float32) - mean * scale

    # --- pass 2: normalize + ELU --------------------------------------------
    out = pl.pallas_call(
        _bn_elu_kernel,
        out_shape=jax.ShapeDtypeStruct((Cout, Lp), jnp.float32),
        grid=grid,
        in_specs=[
            pl.BlockSpec((Cout, T), lambda j: (0, j)),
            pl.BlockSpec((Cout, 1), lambda j: (0, 0)),
            pl.BlockSpec((Cout, 1), lambda j: (0, 0)),
        ],
        out_specs=pl.BlockSpec((Cout, T), lambda j: (0, j)),
        compiler_params=pltpu.CompilerParams(
            dimension_semantics=("parallel",),    # independent tiles
            vmem_limit_bytes=_VMEM_LIMIT,
        ),
    )(y, scale.reshape(Cout, 1), shift.reshape(Cout, 1))

    return out[:, :L].reshape(Cout, N, H, W)


# ---------------------------------------------------------------------------
# MSEM forward
# ---------------------------------------------------------------------------

def msem_forward(x_nchw, params):
    """x_nchw: (N, Cin, H, W).  Returns (N, 90 + Cin, H, W) like MSEM.forward."""
    x_cl = jnp.transpose(x_nchw, (1, 0, 2, 3))   # channels-leading end-to-end

    def block(name, inp):
        p = params[name]
        return tc_block_pallas(inp, p["weight"], p["gamma"], p["beta"],
                               dilation=p["dilation"])

    f11 = block("tcl1", x_cl)
    f12 = block("tcl2", f11)
    f21 = block("tcm1", x_cl)
    f22 = block("tcm2", f21)
    f31 = block("tcs1", x_cl)
    f32 = block("tcs2", f31)

    out_cl = jnp.concatenate([f11, f12, f21, f22, f31, f32, x_cl], axis=0)
    return jnp.transpose(out_cl, (1, 0, 2, 3))


# ---------------------------------------------------------------------------
# Pure-JAX reference (lax conv + training-mode BN + ELU) for validation
# ---------------------------------------------------------------------------

def _tc_block_reference(x, weight, bias, gamma, beta, *, dilation, eps=1e-5):
    K = weight.shape[-1]
    pad = (K // 2) * dilation
    y = jax.lax.conv_general_dilated(
        x, weight, window_strides=(1, 1), padding=((0, 0), (pad, pad)),
        rhs_dilation=(1, dilation),
        dimension_numbers=("NCHW", "OIHW", "NCHW"))
    y = y + bias[None, :, None, None]              # bias kept here to prove it
    mean = y.mean(axis=(0, 2, 3), keepdims=True)   # cancels under training BN
    var = ((y - mean) ** 2).mean(axis=(0, 2, 3), keepdims=True)
    z = (y - mean) * jax.lax.rsqrt(var + eps) * gamma[None, :, None, None] \
        + beta[None, :, None, None]
    return jnp.where(z > 0, z, jnp.expm1(z))       # ELU(alpha=1)


def msem_reference(x, params):
    def block(name, inp):
        p = params[name]
        return _tc_block_reference(inp, p["weight"], p["bias"], p["gamma"],
                                   p["beta"], dilation=p["dilation"])
    f11 = block("tcl1", x)
    f12 = block("tcl2", f11)
    f21 = block("tcm1", x)
    f22 = block("tcm2", f21)
    f31 = block("tcs1", x)
    f32 = block("tcs2", f31)
    return jnp.concatenate([f11, f12, f21, f22, f31, f32, x], axis=1)


# ---------------------------------------------------------------------------
# Test
# ---------------------------------------------------------------------------

def _make_tc_params(key, cin, cout, K, dilation):
    kw, kb, kg, kbe = jax.random.split(key, 4)
    fan_in = float(cin * K)
    return dict(
        weight=jax.random.normal(kw, (cout, cin, 1, K), jnp.float32)
               * (1.0 / fan_in ** 0.5),
        bias=0.1 * jax.random.normal(kb, (cout,), jnp.float32),
        gamma=1.0 + 0.1 * jax.random.normal(kg, (cout,), jnp.float32),
        beta=0.1 * jax.random.normal(kbe, (cout,), jnp.float32),
        dilation=dilation,
    )


if __name__ == "__main__":
    # Small shapes consistent with MSEM: NCHW EEG-style input.
    N, input_size, H, W = 2, 4, 8, 64
    conv1_chans, conv2_chans = 20, 10
    L_kern, M_kern, S_kern = 25, 15, 5

    key = jax.random.PRNGKey(0)
    kx, *ks = jax.random.split(key, 7)
    x = jax.random.normal(kx, (N, input_size, H, W), dtype=jnp.float32)

    params = {
        "tcl1": _make_tc_params(ks[0], input_size, conv1_chans, L_kern, 1),
        "tcl2": _make_tc_params(ks[1], conv1_chans, conv2_chans, L_kern, 3),
        "tcm1": _make_tc_params(ks[2], input_size, conv1_chans, M_kern, 1),
        "tcm2": _make_tc_params(ks[3], conv1_chans, conv2_chans, M_kern, 3),
        "tcs1": _make_tc_params(ks[4], input_size, conv1_chans, S_kern, 1),
        "tcs2": _make_tc_params(ks[5], conv1_chans, conv2_chans, S_kern, 3),
    }

    out = jax.block_until_ready(msem_forward(x, params))
    ref = jax.block_until_ready(msem_reference(x, params))

    c_total = 3 * (conv1_chans + conv2_chans) + input_size
    assert out.shape == (N, c_total, H, W), out.shape
    max_err = float(jnp.max(jnp.abs(out - ref)))
    assert jnp.allclose(out, ref, rtol=1e-3, atol=1e-3), f"max abs err {max_err}"

    print("KERNEL_OK")
</pallas_src>

<mosaic_0001>
module attributes {stable_mosaic.version = 11 : i64} {
  func.func @_conv_stats_kernel(%arg0: i32, %arg1: memref<100x512xf32, #tpu.memory_space<vmem>>, %arg2: memref<20x100xf32, #tpu.memory_space<vmem>>, %arg3: memref<20x512xf32, #tpu.memory_space<vmem>>, %arg4: memref<20x1xf32, #tpu.memory_space<vmem>>, %arg5: memref<20x1xf32, #tpu.memory_space<vmem>>) attributes {dimension_semantics = [#tpu.dimension_semantics<arbitrary>], iteration_bounds = array<i64: 2>, scalar_prefetch = 0 : i64, scratch_operands = 0 : i64, tpu.core_type = #tpu.core_type<tc>, window_params = [{transform_indices = @transform_0, window_bounds = array<i64: 100, 512>}, {pipeline_mode = #tpu.pipeline_mode<synchronous>, transform_indices = @transform_1, window_bounds = array<i64: 20, 100>}, {transform_indices = @transform_2, window_bounds = array<i64: 20, 512>}, {pipeline_mode = #tpu.pipeline_mode<synchronous>, transform_indices = @transform_3, window_bounds = array<i64: 20, 1>}, {pipeline_mode = #tpu.pipeline_mode<synchronous>, transform_indices = @transform_4, window_bounds = array<i64: 20, 1>}]} {
    %c0 = arith.constant 0 : index
    %c0_0 = arith.constant 0 : index
    %0 = vector.load %arg2[%c0, %c0_0] : memref<20x100xf32, #tpu.memory_space<vmem>>, vector<20x100xf32>
    %c0_1 = arith.constant 0 : index
    %c0_2 = arith.constant 0 : index
    %1 = vector.load %arg1[%c0_1, %c0_2] : memref<100x512xf32, #tpu.memory_space<vmem>>, vector<100x512xf32>
    %cst = arith.constant dense<0.000000e+00> : vector<20x512xf32>
    %2 = tpu.matmul %0, %1, %cst {dimension_numbers = #tpu.dot_dimension_numbers<[1], [0], [0], [1], [0, 0, 1, 1], [], []>} : vector<20x100xf32>, vector<100x512xf32>, vector<20x512xf32> -> vector<20x512xf32>
    %c0_3 = arith.constant 0 : index
    %c0_4 = arith.constant 0 : index
    %3 = vector.load %arg3[%c0_3, %c0_4] : memref<20x512xf32, #tpu.memory_space<vmem>>, vector<20x512xf32>
    tpu.vector_store %arg3[%c0_3, %c0_4], %2 {strides = array<i32>} : memref<20x512xf32, #tpu.memory_space<vmem>>, vector<20x512xf32>,
    %c0_i32 = arith.constant 0 : i32
    %4 = arith.cmpi eq, %arg0, %c0_i32 : i32
    %5 = arith.extui %4 : i1 to i32
    %c0_i32_5 = arith.constant 0 : i32
    %6 = arith.cmpi ne, %5, %c0_i32_5 : i32
    scf.if %6 {
      %cst_16 = arith.constant 0.000000e+00 : f32
      %18 = vector.broadcast %cst_16 : f32 to vector<20x1xf32>
      %c0_17 = arith.constant 0 : index
      %c0_18 = arith.constant 0 : index
      %19 = vector.load %arg4[%c0_17, %c0_18] : memref<20x1xf32, #tpu.memory_space<vmem>>, vector<20x1xf32>
      tpu.vector_store %arg4[%c0_17, %c0_18], %18 {strides = array<i32>} : memref<20x1xf32, #tpu.memory_space<vmem>>, vector<20x1xf32>,
      %cst_19 = arith.constant 0.000000e+00 : f32
      %20 = vector.broadcast %cst_19 : f32 to vector<20x1xf32>
      %c0_20 = arith.constant 0 : index
      %c0_21 = arith.constant 0 : index
      %21 = vector.load %arg5[%c0_20, %c0_21] : memref<20x1xf32, #tpu.memory_space<vmem>>, vector<20x1xf32>
      tpu.vector_store %arg5[%c0_20, %c0_21], %20 {strides = array<i32>} : memref<20x1xf32, #tpu.memory_space<vmem>>, vector<20x1xf32>,
    } else {
    }
    %c0_6 = arith.constant 0 : index
    %c0_7 = arith.constant 0 : index
    %7 = vector.load %arg4[%c0_6, %c0_7] : memref<20x1xf32, #tpu.memory_space<vmem>>, vector<20x1xf32>
    %cst_8 = arith.constant dense<0.000000e+00> : vector<20xf32>
    %8 = vector.multi_reduction <add>, %2, %cst_8 [1] : vector<20x512xf32> to vector<20xf32>
    %9 = vector.shape_cast %8 : vector<20xf32> to vector<20x1xf32>
    %10 = arith.addf %7, %9 : vector<20x1xf32>
    %c0_9 = arith.constant 0 : index
    %c0_10 = arith.constant 0 : index
    %11 = vector.load %arg4[%c0_9, %c0_10] : memref<20x1xf32, #tpu.memory_space<vmem>>, vector<20x1xf32>
    tpu.vector_store %arg4[%c0_9, %c0_10], %10 {strides = array<i32>} : memref<20x1xf32, #tpu.memory_space<vmem>>, vector<20x1xf32>,
    %c0_11 = arith.constant 0 : index
    %c0_12 = arith.constant 0 : index
    %12 = vector.load %arg5[%c0_11, %c0_12] : memref<20x1xf32, #tpu.memory_space<vmem>>, vector<20x1xf32>
    %13 = arith.mulf %2, %2 : vector<20x512xf32>
    %cst_13 = arith.constant dense<0.000000e+00> : vector<20xf32>
    %14 = vector.multi_reduction <add>, %13, %cst_13 [1] : vector<20x512xf32> to vector<20xf32>
    %15 = vector.shape_cast %14 : vector<20xf32> to vector<20x1xf32>
    %16 = arith.addf %12, %15 : vector<20x1xf32>
    %c0_14 = arith.constant 0 : index
    %c0_15 = arith.constant 0 : index
    %17 = vector.load %arg5[%c0_14, %c0_15] : memref<20x1xf32, #tpu.memory_space<vmem>>, vector<20x1xf32>
    tpu.vector_store %arg5[%c0_14, %c0_15], %16 {strides = array<i32>} : memref<20x1xf32, #tpu.memory_space<vmem>>, vector<20x1xf32>,
    return
  }
  func.func @transform_0(%arg0: i32) -> (i32, i32) {
    %c0_i32 = arith.constant 0 : i32
    %c0_i32_0 = arith.constant 0 : i32
    return %c0_i32, %arg0 : i32, i32
  }
  func.func @transform_1(%arg0: i32) -> (i32, i32) {
    %c0_i32 = arith.constant 0 : i32
    %c0_i32_0 = arith.constant 0 : i32
    %c0_i32_1 = arith.constant 0 : i32
    return %c0_i32, %c0_i32_0 : i32, i32
  }
  func.func @transform_2(%arg0: i32) -> (i32, i32) {
    %c0_i32 = arith.constant 0 : i32
    %c0_i32_0 = arith.constant 0 : i32
    return %c0_i32, %arg0 : i32, i32
  }
  func.func @transform_3(%arg0: i32) -> (i32, i32) {
    %c0_i32 = arith.constant 0 : i32
    %c0_i32_0 = arith.constant 0 : i32
    %c0_i32_1 = arith.constant 0 : i32
    return %c0_i32, %c0_i32_0 : i32, i32
  }
  func.func @transform_4(%arg0: i32) -> (i32, i32) {
    %c0_i32 = arith.constant 0 : i32
    %c0_i32_0 = arith.constant 0 : i32
    %c0_i32_1 = arith.constant 0 : i32
    return %c0_i32, %c0_i32_0 : i32, i32
  }
}

module attributes {stable_mosaic.version = 11 : i64} {
  func.func @_bn_elu_kernel(%arg0: i32, %arg1: memref<20x512xf32, #tpu.memory_space<vmem>>, %arg2: memref<20x1xf32, #tpu.memory_space<vmem>>, %arg3: memref<20x1xf32, #tpu.memory_space<vmem>>, %arg4: memref<20x512xf32, #tpu.memory_space<vmem>>) attributes {dimension_semantics = [#tpu.dimension_semantics<parallel>], iteration_bounds = array<i64: 2>, scalar_prefetch = 0 : i64, scratch_operands = 0 : i64, tpu.core_type = #tpu.core_type<tc>, window_params = [{transform_indices = @transform_0, window_bounds = array<i64: 20, 512>}, {pipeline_mode = #tpu.pipeline_mode<synchronous>, transform_indices = @transform_1, window_bounds = array<i64: 20, 1>}, {pipeline_mode = #tpu.pipeline_mode<synchronous>, transform_indices = @transform_2, window_bounds = array<i64: 20, 1>}, {transform_indices = @transform_3, window_bounds = array<i64: 20, 512>}]} {
    %c0 = arith.constant 0 : index
    %c0_0 = arith.constant 0 : index
    %0 = vector.load %arg1[%c0, %c0_0] : memref<20x512xf32, #tpu.memory_space<vmem>>, vector<20x512xf32>
    %c0_1 = arith.constant 0 : index
    %c0_2 = arith.constant 0 : index
    %1 = vector.load %arg2[%c0_1, %c0_2] : memref<20x1xf32, #tpu.memory_space<vmem>>, vector<20x1xf32>
    %2 = vector.broadcast %1 : vector<20x1xf32> to vector<20x512xf32>
    %3 = arith.mulf %0, %2 : vector<20x512xf32>
    %c0_3 = arith.constant 0 : index
    %c0_4 = arith.constant 0 : index
    %4 = vector.load %arg3[%c0_3, %c0_4] : memref<20x1xf32, #tpu.memory_space<vmem>>, vector<20x1xf32>
    %5 = vector.broadcast %4 : vector<20x1xf32> to vector<20x512xf32>
    %6 = arith.addf %3, %5 : vector<20x512xf32>
    %cst = arith.constant 0.000000e+00 : f32
    %7 = vector.broadcast %cst : f32 to vector<20x512xf32>
    %8 = arith.cmpf ogt, %6, %7 : vector<20x512xf32>
    %cst_5 = arith.constant 0.000000e+00 : f32
    %9 = vector.broadcast %cst_5 : f32 to vector<20x512xf32>
    %10 = arith.minimumf %6, %9 : vector<20x512xf32>
    %11 = math.exp %10 : vector<20x512xf32>
    %cst_6 = arith.constant 1.000000e+00 : f32
    %12 = vector.broadcast %cst_6 : f32 to vector<20x512xf32>
    %13 = arith.subf %11, %12 : vector<20x512xf32>
    %14 = arith.select %8, %6, %13 : vector<20x512xi1>, vector<20x512xf32>
    %c0_7 = arith.constant 0 : index
    %c0_8 = arith.constant 0 : index
    %15 = vector.load %arg4[%c0_7, %c0_8] : memref<20x512xf32, #tpu.memory_space<vmem>>, vector<20x512xf32>
    tpu.vector_store %arg4[%c0_7, %c0_8], %14 {strides = array<i32>} : memref<20x512xf32, #tpu.memory_space<vmem>>, vector<20x512xf32>,
    return
  }
  func.func @transform_0(%arg0: i32) -> (i32, i32) {
    %c0_i32 = arith.constant 0 : i32
    %c0_i32_0 = arith.constant 0 : i32
    return %c0_i32, %arg0 : i32, i32
  }
  func.func @transform_1(%arg0: i32) -> (i32, i32) {
    %c0_i32 = arith.constant 0 : i32
    %c0_i32_0 = arith.constant 0 : i32
    %c0_i32_1 = arith.constant 0 : i32
    return %c0_i32, %c0_i32_0 : i32, i32
  }
  func.func @transform_2(%arg0: i32) -> (i32, i32) {
    %c0_i32 = arith.constant 0 : i32
    %c0_i32_0 = arith.constant 0 : i32
    %c0_i32_1 = arith.constant 0 : i32
    return %c0_i32, %c0_i32_0 : i32, i32
  }
  func.func @transform_3(%arg0: i32) -> (i32, i32) {
    %c0_i32 = arith.constant 0 : i32
    %c0_i32_0 = arith.constant 0 : i32
    return %c0_i32, %arg0 : i32, i32
  }
}

</mosaic_0001>

<bundles_post_ra>
// kernel: tc_block_pallas.3
= control target key start
LH: loop header
LB: loop body
LE: loop exit
PB: predicated region body
PF: predicated region fallthrough
CT: control target
= control target key end

     0   :  { %s593_s12 = smov 0   ;;  %s595_s13 = smov 0   ;;  %s775_s0 = inlined_call_operand.vmem [shape: f32[20,1024], index: 0, kind: input, shape index: {}]   ;;  %s776_s1 = inlined_call_operand.vmem [shape: f32[20,1], index: 1, kind: input, shape index: {}]   ;;  %s777_s2 = inlined_call_operand.vmem [shape: f32[20,1], index: 2, kind: input, shape index: {}]   ;;  %s778_s3 = inlined_call_operand.vmem [shape: f32[20,1024], index: 3, kind: output, shape index: {}]  }
   0x1   :  { %s597_s14 = smov 0  }
   0x2 LB: > { %s470_s15 = sadd.s32 4294967295, %s570_s14   ;;  %s610_s16 = sadd.s32 1, %s570_s14   ;;  %s570_s14 = sphi %s597_s14, %s782_s14   ;;  %s566_s13 = sphi %s595_s13, %s781_s13   ;;  %s562_s12 = sphi %s593_s12, %s780_s12  }
   0x3   : > { %s17_s17 = ssub.s32 %s570_s14, %s610_s16  ;;  %s20_s18 = sadd.s32 1, %s566_s13 }
   0x4   : > { %p18_p0 = scmp.eq.s32.totalorder %s17_s17, 0  ;;  %p27_p1 = scmp.ne.s32.totalorder %s566_s13, %s562_s12 }
   0x5   : > { %p28_p2 = scmp.eq.s32.totalorder %s570_s14, 0  ;;  %p99_p3 = scmp.eq.s32.totalorder %s470_s15, 1 }
   0x6   : > { %s621_s19 = scalar_select %p18_p0, %s566_s13, %s20_s18  }
   0x7   : > { %p29_p4 = por %p28_p2, %p27_p1  ;;  %p623_p5 = por %p99_p3, %p27_p1 }
   0x8   : > { %p473_p6 = scmp.ge.s32.totalorder %s570_s14, 2 }
   0xa   : > { %127 = sbr.rel (%p473_p6) target bundleno = 28 (0x1c), region = 24 }
  0x11   : > { %130 = sbr.rel (!%p29_p4) target bundleno = 28 (0x1c), region = 28  ;;  %s132_s21 = sand.u32 (%p29_p4), 1, %s566_s13  }
  0x12   : > { %s493_s22 = sshll.u32 (%p29_p4), %s570_s14, 5  ;;  %s495_s23 = smul.u32 (%p29_p4), 96, %s132_s21 }
  0x13   : > { %s137_s26 = scalar_lea.vmem (%p29_p4), %s775_s0, %s493_s22 }
  0x14   : > { %v150_v0 = vld [vmem:[%s137_s26] sm:$0xff] (%p29_p4)  ;;  %v152_v1 = vld [vmem:[%s137_s26 + $0x8] sm:$0xff] (%p29_p4)  ;;  %v154_v2 = vld [vmem:[%s137_s26 + $0x10] sm:$0xff] (%p29_p4)  ;;  %s134_s27 = scalar_lea.vmem (%p29_p4), [#allocation2], %s495_s23 }
  0x15   : > { %v156_v3 = vld [vmem:[%s137_s26 + $0x18] sm:$0xff] (%p29_p4)  ;;  %v158_v4 = vld [vmem:[%s137_s26 + $0x40] sm:$0xff] (%p29_p4)  ;;  %v160_v5 = vld [vmem:[%s137_s26 + $0x48] sm:$0xff] (%p29_p4)  ;;  %151 = vst [vmem:[%s134_s27] sm:$0xff] (%p29_p4), %v150_v0 }
  0x16   : > { %153 = vst [vmem:[%s134_s27 + $0x8] sm:$0xff] (%p29_p4), %v152_v1  ;;  %155 = vst [vmem:[%s134_s27 + $0x10] sm:$0xff] (%p29_p4), %v154_v2  ;;  %v162_v6 = vld [vmem:[%s137_s26 + $0x50] sm:$0xff] (%p29_p4)  ;;  %v164_v7 = vld [vmem:[%s137_s26 + $0x58] sm:$0xff] (%p29_p4) }
  0x17   : > { %157 = vst [vmem:[%s134_s27 + $0x18] sm:$0xff] (%p29_p4), %v156_v3  ;;  %159 = vst [vmem:[%s134_s27 + $0x20] sm:$0xff] (%p29_p4), %v158_v4  ;;  %v166_v8 = vld [vmem:[%s137_s26 + $0x80] sm:$0xff] (%p29_p4)  ;;  %v168_v9 = vld [vmem:[%s137_s26 + $0x88] sm:$0xff] (%p29_p4) }
  0x18   : > { %161 = vst [vmem:[%s134_s27 + $0x28] sm:$0xff] %v160_v5  ;;  %163 = vst [vmem:[%s134_s27 + $0x30] sm:$0xff] %v162_v6  ;;  %v170_v10 = vld [vmem:[%s137_s26 + $0x90] sm:$0xff]  ;;  %v172_v11 = vld [vmem:[%s137_s26 + $0x98] sm:$0xff] }
  0x19   : > { %165 = vst [vmem:[%s134_s27 + $0x38] sm:$0xff] %v164_v7  ;;  %167 = vst [vmem:[%s134_s27 + $0x40] sm:$0xff] %v166_v8 }
  0x1a   : > { %169 = vst [vmem:[%s134_s27 + $0x48] sm:$0xff] %v168_v9  ;;  %171 = vst [vmem:[%s134_s27 + $0x50] sm:$0xff] %v170_v10 }
  0x1b   : > { %173 = vst [vmem:[%s134_s27 + $0x58] sm:$0xff] %v172_v11 }
  0x1c PF: > { %p476_p7 = scmp.ge.s32.totalorder %s570_s14, 1  ;;  %p178_p8 = scmp.lt.s32.totalorder %s570_s14, 3 }
  0x1e   : > { %p179_p9 = pnand %p476_p7, %p178_p8 }
  0x1f   : > { %v223_v12 = vld [vmem:[%s776_s1 + $0x10] sm:$0xf] (!%p179_p9)  ;;  %v221_v13 = vld [vmem:[%s776_s1] sm:$0xff] (!%p179_p9)  ;;  %v572_v14 = vmov (!%p179_p9), 0   ;;  %v222_v16 = vld [vmem:[%s776_s1 + $0x8] sm:$0xff] (!%p179_p9)  ;;  %s185_s18 = sand.u32 (!%p179_p9), 1, %s562_s12  }
  0x20   : > { %182 = sbr.rel (%p179_p9) target bundleno = 206 (0xce), region = 51  ;;  %523 = vset.pattern.permute.xlu1 (!%p179_p9), %v572_v14  ;;  %522 = vset.pattern.permute.xlu0 (!%p179_p9), %v572_v14  ;;  %v251_v15 = vld [vmem:[%s777_s2] sm:$0xff] (!%p179_p9)  ;;  %v253_v17 = vld [vmem:[%s777_s2 + $0x10] sm:$0xf] (!%p179_p9)  ;;  %v252_v18 = vld [vmem:[%s777_s2 + $0x8] sm:$0xff] (!%p179_p9) }
  0x21   : > { %236 = vperm.xlu1 (!%p179_p9), %523, %v223_v12   ;;  %226 = vperm.xlu0 (!%p179_p9), %522, %v221_v13   ;;  %s654_s21 = smul.u32 (!%p179_p9), 96, %s185_s18 }
  0x23   : > { %s657_s22 = scalar_lea.vmem (!%p179_p9), [#allocation2], %s654_s21  ;;  %s713_s12 = scalar_lea.vmem (!%p179_p9), [#allocation3], %s654_s21 }
  0x24   : > { %v209_v19 = vld [vmem:[%s657_s22] sm:$0xff] (!%p179_p9)  ;;  %v210_v22 = vld [vmem:[%s657_s22 + $0x8] sm:$0xff] (!%p179_p9)  ;;  %v211_v23 = vld [vmem:[%s657_s22 + $0x10] sm:$0xff] (!%p179_p9) }
  0x25   : > { %256 = vperm.xlu1 (!%p179_p9), %523, %v251_v15   ;;  %231 = vperm.xlu0 (!%p179_p9), %522, %v222_v16   ;;  %v212_v24 = vld [vmem:[%s657_s22 + $0x18] sm:$0xff] (!%p179_p9)  ;;  %v217_v29 = vld [vmem:[%s657_s22 + $0x40] sm:$0xf] (!%p179_p9)  ;;  %v218_v32 = vld [vmem:[%s657_s22 + $0x48] sm:$0xf] (!%p179_p9) }
  0x26   : > { %v219_v33 = vld [vmem:[%s657_s22 + $0x50] sm:$0xf] (!%p179_p9)  ;;  %v220_v34 = vld [vmem:[%s657_s22 + $0x58] sm:$0xf] (!%p179_p9)  ;;  %v213_v43 = vld [vmem:[%s657_s22 + $0x20] sm:$0xff] (!%p179_p9) }
  0x27   : > { %v214_v44 = vld [vmem:[%s657_s22 + $0x28] sm:$0xff]  ;;  %v215_v50 = vld [vmem:[%s657_s22 + $0x30] sm:$0xff]  ;;  %v216_v51 = vld [vmem:[%s657_s22 + $0x38] sm:$0xff]  ;;  %s494_s23 = sshll.u32 (%p623_p5), %s470_s15, 5 }
  0x28   : > { %s374_s20 = scalar_lea.vmem (%p623_p5), %s778_s3, %s494_s23 }
  0x29   : > { %266 = vperm.xlu1 %523, %v253_v17   ;;  %261 = vperm.xlu0 %522, %v252_v18  }
  0xa0   : > { %v237_v20 = vpop.permute.xlu1 %236  ;;  %v227_v21 = vpop.permute.xlu0 %226 }
  0xa1   : > { %v239_v25 = vmul.f32 %v227_v21, %v209_v19  ;;  %v240_v26 = vmul.f32 %v227_v21, %v210_v22  ;;  %v241_v27 = vmul.f32 %v227_v21, %v211_v23  ;;  %v242_v28 = vmul.f32 %v227_v21, %v212_v24 }
  0xa2   : > { %v247_v39 = vmul.f32 %v237_v20, %v217_v29  ;;  %v248_v40 = vmul.f32 %v237_v20, %v218_v32  ;;  %v249_v41 = vmul.f32 %v237_v20, %v219_v33  ;;  %v250_v42 = vmul.f32 %v237_v20, %v220_v34 }
  0xa4   : > { %v257_v30 = vpop.permute.xlu1 %256  ;;  %v232_v31 = vpop.permute.xlu0 %231 }
  0xa5   : > { %v667_v35 = vadd.f32 %v257_v30, %v239_v25  ;;  %v669_v36 = vadd.f32 %v257_v30, %v240_v26  ;;  %v671_v37 = vadd.f32 %v257_v30, %v241_v27  ;;  %v673_v38 = vadd.f32 %v257_v30, %v242_v28 }
  0xa6   : > { %v243_v60 = vmul.f32 %v232_v31, %v213_v43  ;;  %v244_v62 = vmul.f32 %v232_v31, %v214_v44  ;;  %v245_v63 = vmul.f32 %v232_v31, %v215_v50  ;;  %v246_v0 = vmul.f32 %v232_v31, %v216_v51 }
  0xa7   : > { %v293_v45 = vmin.f32 %v667_v35, 0.0  ;;  %v294_v46 = vmin.f32 %v669_v36, 0.0  ;;  %v295_v47 = vmin.f32 %v671_v37, 0.0  ;;  %v296_v48 = vmin.f32 %v673_v38, 0.0 }
  0xa8   : > { %v267_v49 = vpop.permute.xlu1 %266  ;;  %v262_v56 = vpop.permute.xlu0 %261  ;;  %vm281_vm0 = vcmp.gt.f32.partialorder %v667_v35, 0.0  ;;  %vm282_vm1 = vcmp.gt.f32.partialorder %v669_v36, 0.0  ;;  %vm283_vm2 = vcmp.gt.f32.partialorder %v671_v37, 0.0  ;;  %vm284_vm3 = vcmp.gt.f32.partialorder %v673_v38, 0.0 }
  0xa9   : > { %v683_v52 = vadd.f32 %v267_v49, %v247_v39  ;;  %v685_v53 = vadd.f32 %v267_v49, %v248_v40  ;;  %v687_v54 = vadd.f32 %v267_v49, %v249_v41  ;;  %v689_v55 = vadd.f32 %v267_v49, %v250_v42 }
  0xaa   : > { %v305_v57 = vmul.f32 1.442695, %v293_v45  ;;  %v307_v58 = vmul.f32 1.442695, %v294_v46  ;;  %v309_v59 = vmul.f32 1.442695, %v295_v47  ;;  %v693_v3 = vadd.f32 %v262_v56, %v243_v60 }
  0xab   : > { %v311_v61 = vmul.f32 1.442695, %v296_v48  ;;  %v301_v1 = vmin.f32 %v683_v52, 0.0  ;;  %v302_v2 = vmin.f32 %v685_v53, 0.0  ;;  %v303_v4 = vmin.f32 %v687_v54, 0.0 }
  0xac   : > { %524 = vpow2.f32 %v305_v57  ;;  %v304_v5 = vmin.f32 %v689_v55, 0.0  ;;  %v697_v6 = vadd.f32 %v262_v56, %v244_v62  ;;  %v699_v9 = vadd.f32 %v262_v56, %v245_v63 }
  0xad   : > { %526 = vpow2.f32 %v307_v58  ;;  %v321_v7 = vmul.f32 1.442695, %v301_v1  ;;  %v323_v8 = vmul.f32 1.442695, %v302_v2  ;;  %v325_v10 = vmul.f32 1.442695, %v303_v4 }
  0xae   : > { %528 = vpow2.f32 %v309_v59  ;;  %v327_v11 = vmul.f32 1.442695, %v304_v5  ;;  %v701_v12 = vadd.f32 %v262_v56, %v246_v0  ;;  %v297_v13 = vmin.f32 %v693_v3, 0.0 }
  0xaf   : > { %530 = vpow2.f32 %v311_v61  ;;  %v298_v14 = vmin.f32 %v697_v6, 0.0  ;;  %v299_v15 = vmin.f32 %v699_v9, 0.0  ;;  %vm289_vm4 = vcmp.gt.f32.partialorder %v683_v52, 0.0 }
  0xb0   : > { %532 = vpow2.f32 %v321_v7  ;;  %v300_v16 = vmin.f32 %v701_v12, 0.0  ;;  %v313_v17 = vmul.f32 1.442695, %v297_v13  ;;  %vm290_vm5 = vcmp.gt.f32.partialorder %v685_v53, 0.0 }
  0xb1   : > { %534 = vpow2.f32 %v323_v8  ;;  %v315_v18 = vmul.f32 1.442695, %v298_v14  ;;  %v317_v19 = vmul.f32 1.442695, %v299_v15  ;;  %vm291_vm6 = vcmp.gt.f32.partialorder %v687_v54, 0.0 }
  0xb2   : > { %536 = vpow2.f32 %v325_v10  ;;  %v319_v20 = vmul.f32 1.442695, %v300_v16  ;;  %vm292_vm7 = vcmp.gt.f32.partialorder %v689_v55, 0.0  ;;  %vm285_vm8 = vcmp.gt.f32.partialorder %v693_v3, 0.0 }
  0xb3   : > { %538 = vpow2.f32 %v327_v11  ;;  %vm286_vm9 = vcmp.gt.f32.partialorder %v697_v6, 0.0  ;;  %vm287_vm10 = vcmp.gt.f32.partialorder %v699_v9, 0.0  ;;  %vm288_vm11 = vcmp.gt.f32.partialorder %v701_v12, 0.0 }
  0xb4   : > { %540 = vpow2.f32 %v313_v17 }
  0xb5   : > { %542 = vpow2.f32 %v315_v18 }
  0xb6   : > { %v525_v21 = vpop.eup %524  ;;  %544 = vpow2.f32 %v317_v19 }
  0xb7   : > { %v527_v22 = vpop.eup %526  ;;  %v477_v23 = vadd.f32 -1.0, %v525_v21  ;;  %546 = vpow2.f32 %v319_v20 }
  0xb8   : > { %v529_v24 = vpop.eup %528  ;;  %v478_v25 = vadd.f32 -1.0, %v527_v22 }
  0xb9   : > { %v531_v26 = vpop.eup %530  ;;  %v479_v27 = vadd.f32 -1.0, %v529_v24  ;;  %v341_v28 = vsel %vm281_vm0, %v667_v35, %v477_v23 }
  0xba   : > { %v533_v29 = vpop.eup %532  ;;  %v480_v30 = vadd.f32 -1.0, %v531_v26  ;;  %v342_v31 = vsel %vm282_vm1, %v669_v36, %v478_v25  ;;  %353 = vst [vmem:[%s713_s12] sm:$0xff] %v341_v28 }
  0xbb   : > { %v535_v32 = vpop.eup %534  ;;  %v343_v33 = vsel %vm283_vm2, %v671_v37, %v479_v27  ;;  %354 = vst [vmem:[%s713_s12 + $0x8] sm:$0xff] %v342_v31  ;;  %v485_v34 = vadd.f32 -1.0, %v533_v29 }
  0xbc   : > { %v537_v35 = vpop.eup %536  ;;  %v344_v39 = vsel %vm284_vm3, %v673_v38, %v480_v30  ;;  %355 = vst [vmem:[%s713_s12 + $0x10] sm:$0xff] %v343_v33  ;;  %v486_v36 = vadd.f32 -1.0, %v535_v32 }
  0xbd   : > { %v539_v40 = vpop.eup %538  ;;  %356 = vst [vmem:[%s713_s12 + $0x18] sm:$0xff] %v344_v39  ;;  %v487_v41 = vadd.f32 -1.0, %v537_v35  ;;  %v349_v37 = vsel %vm289_vm4, %v683_v52, %v485_v34 }
  0xbe   : > { %v488_v42 = vadd.f32 -1.0, %v539_v40  ;;  %v350_v43 = vsel %vm290_vm5, %v685_v53, %v486_v36  ;;  %361 = vst [vmem:[%s713_s12 + $0x40] sm:$0xf] %v349_v37  ;;  %v541_v38 = vpop.eup %540 }
  0xbf   : > { %v351_v44 = vsel %vm291_vm6, %v687_v54, %v487_v41  ;;  %362 = vst [vmem:[%s713_s12 + $0x48] sm:$0xf] %v350_v43  ;;  %v543_v45 = vpop.eup %542  ;;  %v481_v47 = vadd.f32 -1.0, %v541_v38  ;;  %371 = sbr.rel (!%p623_p5) target bundleno = 206 (0xce), region = 59 }
  0xc0   : > { %v352_v46 = vsel %vm292_vm7, %v689_v55, %v488_v42  ;;  %363 = vst [vmem:[%s713_s12 + $0x50] sm:$0xf] %v351_v44  ;;  %v545_v48 = vpop.eup %544  ;;  %v482_v49 = vadd.f32 -1.0, %v543_v45 }
  0xc1   : > { %364 = vst [vmem:[%s713_s12 + $0x58] sm:$0xf] %v352_v46  ;;  %v547_v50 = vpop.eup %546  ;;  %v483_v51 = vadd.f32 -1.0, %v545_v48  ;;  %v345_v52 = vsel %vm285_vm8, %v693_v3, %v481_v47  ;;  %v387_v57 = vld [vmem:[%s713_s12] sm:$0xff] (%p623_p5) }
  0xc2   : > { %v484_v53 = vadd.f32 -1.0, %v547_v50  ;;  %v346_v54 = vsel %vm286_vm9, %v697_v6, %v482_v49  ;;  %357 = vst [vmem:[%s713_s12 + $0x20] sm:$0xff] %v345_v52  ;;  %v389_v58 = vld [vmem:[%s713_s12 + $0x8] sm:$0xff] (%p623_p5)  ;;  %388 = vst [vmem:[%s374_s20] sm:$0xff] (%p623_p5), %v387_v57 }
  0xc3   : > { %v347_v55 = vsel %vm287_vm10, %v699_v9, %v483_v51  ;;  %358 = vst [vmem:[%s713_s12 + $0x28] sm:$0xff] %v346_v54  ;;  %v391_v59 = vld [vmem:[%s713_s12 + $0x10] sm:$0xff] (%p623_p5)  ;;  %390 = vst [vmem:[%s374_s20 + $0x8] sm:$0xff] (%p623_p5), %v389_v58 }
  0xc4   : > { %v348_v56 = vsel %vm288_vm11, %v701_v12, %v484_v53  ;;  %359 = vst [vmem:[%s713_s12 + $0x30] sm:$0xff] %v347_v55  ;;  %v393_v60 = vld [vmem:[%s713_s12 + $0x18] sm:$0xff] (%p623_p5)  ;;  %392 = vst [vmem:[%s374_s20 + $0x10] sm:$0xff] (%p623_p5), %v391_v59 }
  0xc5   : > { %360 = vst [vmem:[%s713_s12 + $0x38] sm:$0xff] %v348_v56  ;;  %394 = vst [vmem:[%s374_s20 + $0x18] sm:$0xff] (%p623_p5), %v393_v60  ;;  %v403_v1 = vld [vmem:[%s713_s12 + $0x40] sm:$0xff] (%p623_p5) }
  0xc6   : > { %404 = vst [vmem:[%s374_s20 + $0x80] sm:$0xff] %v403_v1  ;;  %v405_v2 = vld [vmem:[%s713_s12 + $0x48] sm:$0xff] }
  0xc7   : > { %v407_v3 = vld [vmem:[%s713_s12 + $0x50] sm:$0xff]  ;;  %406 = vst [vmem:[%s374_s20 + $0x88] sm:$0xff] %v405_v2 }
  0xc8   : > { %v409_v4 = vld [vmem:[%s713_s12 + $0x58] sm:$0xff]  ;;  %408 = vst [vmem:[%s374_s20 + $0x90] sm:$0xff] %v407_v3 }
  0xc9   : > { %v395_v61 = vld [vmem:[%s713_s12 + $0x20] sm:$0xff]  ;;  %410 = vst [vmem:[%s374_s20 + $0x98] sm:$0xff] %v409_v4 }
  0xca   : > { %v397_v62 = vld [vmem:[%s713_s12 + $0x28] sm:$0xff]  ;;  %396 = vst [vmem:[%s374_s20 + $0x40] sm:$0xff] %v395_v61 }
  0xcb   : > { %398 = vst [vmem:[%s374_s20 + $0x48] sm:$0xff] %v397_v62  ;;  %v399_v63 = vld [vmem:[%s713_s12 + $0x30] sm:$0xff] }
  0xcc   : > { %v401_v0 = vld [vmem:[%s713_s12 + $0x38] sm:$0xff]  ;;  %400 = vst [vmem:[%s374_s20 + $0x50] sm:$0xff] %v399_v63 }
  0xcd   : > { %402 = vst [vmem:[%s374_s20 + $0x58] sm:$0xff] %v401_v0 }
  0xce PF: > { %p10_p10 = scmp.ge.s32.totalorder %s610_s16, 4   ;;  %s780_s12 = smov %s566_s13 }
  0xcf   : > { %s781_s13 = smov %s621_s19  ;;  %s782_s14 = smov %s610_s16 }
  0xd0   :  { %12 = sbr.rel (!%p10_p10) target bundleno = 2 (0x2), region = 113 }

// kernel: tc_block_pallas.2
= control target key start
LH: loop header
LB: loop body
LE: loop exit
PB: predicated region body
PF: predicated region fallthrough
CT: control target
= control target key end

     0   :  { %s918_s15 = smov 0   ;;  %s920_s16 = smov 0   ;;  %s1258_s0 = inlined_call_operand.vmem [shape: f32[100,1024], index: 0, kind: input, shape index: {}]   ;;  %s1259_s1 = inlined_call_operand.vmem [shape: f32[20,100], index: 1, kind: input, shape index: {}]   ;;  %s1260_s2 = inlined_call_operand.vmem [shape: f32[20,1024], index: 2, kind: output, shape index: {0}]   ;;  %s1261_s3 = inlined_call_operand.vmem [shape: f32[20,1], index: 3, kind: output, shape index: {1}]   ;;  %s1262_s4 = inlined_call_operand.vmem [shape: f32[20,1], index: 4, kind: output, shape index: {2}]  }
   0x1   :  { %s922_s17 = smov 0  }
   0x2 LB: > { %s934_s18 = sadd.s32 4294967295, %s889_s17   ;;  %s937_s19 = sadd.s32 1, %s889_s17   ;;  %s889_s17 = sphi %s922_s17, %s1266_s17   ;;  %s885_s16 = sphi %s920_s16, %s1265_s16   ;;  %s881_s15 = sphi %s918_s15, %s1264_s15  }
   0x3   : > { %s19_s20 = ssub.s32 %s889_s17, %s937_s19  ;;  %s22_s21 = sadd.s32 1, %s885_s16 }
   0x4   : > { %p20_p0 = scmp.eq.s32.totalorder %s19_s20, 0  ;;  %p29_p1 = scmp.ne.s32.totalorder %s885_s16, %s881_s15 }
   0x5   : > { %p30_p2 = scmp.eq.s32.totalorder %s889_s17, 0  ;;  %p80_p3 = scmp.eq.s32.totalorder %s934_s18, 1 }
   0x6   : > { %s947_s22 = scalar_select %p20_p0, %s885_s16, %s22_s21  }
   0x7   : > { %p31_p4 = por %p30_p2, %p29_p1  ;;  %p949_p5 = por %p80_p3, %p29_p1 }
   0x8   : > { %p769_p6 = scmp.ge.s32.totalorder %s889_s17, 2 }
   0xa   : > { %147 = sbr.rel (%p769_p6) target bundleno = 48 (0x30), region = 20 }
  0x11   : > { %150 = sbr.rel (!%p31_p4) target bundleno = 48 (0x30), region = 24  ;;  %s152_s24 = sand.u32 (%p31_p4), 1, %s885_s16  }
  0x12   : > { %s788_s25 = sshll.u32 (%p31_p4), %s889_s17, 5  ;;  %s838_s26 = smul.u32 (%p31_p4), 416, %s152_s24 }
  0x13   : > { %s959_s29 = scalar_lea.vmem (%p31_p4), %s1258_s0, %s788_s25 }
  0x14   : > { %v170_v0 = vld [vmem:[%s959_s29] sm:$0xff] (%p31_p4)  ;;  %v172_v1 = vld [vmem:[%s959_s29 + $0x8] sm:$0xff] (%p31_p4)  ;;  %v174_v2 = vld [vmem:[%s959_s29 + $0x10] sm:$0xff] (%p31_p4)  ;;  %s967_s30 = scalar_lea.vmem (%p31_p4), [#allocation2], %s838_s26 }
  0x15   : > { %v176_v3 = vld [vmem:[%s959_s29 + $0x18] sm:$0xff] (%p31_p4)  ;;  %v178_v4 = vld [vmem:[%s959_s29 + $0x40] sm:$0xff] (%p31_p4)  ;;  %v180_v5 = vld [vmem:[%s959_s29 + $0x48] sm:$0xff] (%p31_p4)  ;;  %171 = vst [vmem:[%s967_s30] sm:$0xff] (%p31_p4), %v170_v0 }
  0x16   : > { %173 = vst [vmem:[%s967_s30 + $0x8] sm:$0xff] (%p31_p4), %v172_v1  ;;  %175 = vst [vmem:[%s967_s30 + $0x10] sm:$0xff] (%p31_p4), %v174_v2  ;;  %v182_v6 = vld [vmem:[%s959_s29 + $0x50] sm:$0xff] (%p31_p4)  ;;  %v184_v7 = vld [vmem:[%s959_s29 + $0x58] sm:$0xff] (%p31_p4) }
  0x17   : > { %177 = vst [vmem:[%s967_s30 + $0x18] sm:$0xff] (%p31_p4), %v176_v3  ;;  %179 = vst [vmem:[%s967_s30 + $0x20] sm:$0xff] (%p31_p4), %v178_v4  ;;  %v186_v8 = vld [vmem:[%s959_s29 + $0x80] sm:$0xff] (%p31_p4)  ;;  %v188_v9 = vld [vmem:[%s959_s29 + $0x88] sm:$0xff] (%p31_p4) }
  0x18   : > { %181 = vst [vmem:[%s967_s30 + $0x28] sm:$0xff] %v180_v5  ;;  %183 = vst [vmem:[%s967_s30 + $0x30] sm:$0xff] %v182_v6  ;;  %v190_v10 = vld [vmem:[%s959_s29 + $0x90] sm:$0xff]  ;;  %v192_v11 = vld [vmem:[%s959_s29 + $0x98] sm:$0xff] }
  0x19   : > { %185 = vst [vmem:[%s967_s30 + $0x38] sm:$0xff] %v184_v7  ;;  %187 = vst [vmem:[%s967_s30 + $0x40] sm:$0xff] %v186_v8  ;;  %v194_v12 = vld [vmem:[%s959_s29 + $0xc0] sm:$0xff]  ;;  %v196_v13 = vld [vmem:[%s959_s29 + $0xc8] sm:$0xff] }
  0x1a   : > { %189 = vst [vmem:[%s967_s30 + $0x48] sm:$0xff] %v188_v9  ;;  %191 = vst [vmem:[%s967_s30 + $0x50] sm:$0xff] %v190_v10  ;;  %v198_v14 = vld [vmem:[%s959_s29 + $0xd0] sm:$0xff]  ;;  %v200_v15 = vld [vmem:[%s959_s29 + $0xd8] sm:$0xff] }
  0x1b   : > { %193 = vst [vmem:[%s967_s30 + $0x58] sm:$0xff] %v192_v11  ;;  %195 = vst [vmem:[%s967_s30 + $0x60] sm:$0xff] %v194_v12  ;;  %v202_v16 = vld [vmem:[%s959_s29 + $0x100] sm:$0xff]  ;;  %v204_v17 = vld [vmem:[%s959_s29 + $0x108] sm:$0xff] }
  0x1c   : > { %197 = vst [vmem:[%s967_s30 + $0x68] sm:$0xff] %v196_v13  ;;  %199 = vst [vmem:[%s967_s30 + $0x70] sm:$0xff] %v198_v14  ;;  %v206_v18 = vld [vmem:[%s959_s29 + $0x110] sm:$0xff]  ;;  %v208_v19 = vld [vmem:[%s959_s29 + $0x118] sm:$0xff] }
  0x1d   : > { %201 = vst [vmem:[%s967_s30 + $0x78] sm:$0xff] %v200_v15  ;;  %203 = vst [vmem:[%s967_s30 + $0x80] sm:$0xff] %v202_v16  ;;  %v210_v20 = vld [vmem:[%s959_s29 + $0x140] sm:$0xff]  ;;  %v212_v21 = vld [vmem:[%s959_s29 + $0x148] sm:$0xff] }
  0x1e   : > { %205 = vst [vmem:[%s967_s30 + $0x88] sm:$0xff] %v204_v17  ;;  %207 = vst [vmem:[%s967_s30 + $0x90] sm:$0xff] %v206_v18  ;;  %v214_v22 = vld [vmem:[%s959_s29 + $0x150] sm:$0xff]  ;;  %v216_v23 = vld [vmem:[%s959_s29 + $0x158] sm:$0xff] }
  0x1f   : > { %209 = vst [vmem:[%s967_s30 + $0x98] sm:$0xff] %v208_v19  ;;  %211 = vst [vmem:[%s967_s30 + $0xa0] sm:$0xff] %v210_v20  ;;  %v218_v24 = vld [vmem:[%s959_s29 + $0x180] sm:$0xff]  ;;  %v220_v25 = vld [vmem:[%s959_s29 + $0x188] sm:$0xff] }
  0x20   : > { %213 = vst [vmem:[%s967_s30 + $0xa8] sm:$0xff] %v212_v21  ;;  %215 = vst [vmem:[%s967_s30 + $0xb0] sm:$0xff] %v214_v22  ;;  %v222_v26 = vld [vmem:[%s959_s29 + $0x190] sm:$0xff]  ;;  %v224_v27 = vld [vmem:[%s959_s29 + $0x198] sm:$0xff] }
  0x21   : > { %217 = vst [vmem:[%s967_s30 + $0xb8] sm:$0xff] %v216_v23  ;;  %219 = vst [vmem:[%s967_s30 + $0xc0] sm:$0xff] %v218_v24  ;;  %v226_v28 = vld [vmem:[%s959_s29 + $0x1c0] sm:$0xff]  ;;  %v228_v29 = vld [vmem:[%s959_s29 + $0x1c8] sm:$0xff] }
  0x22   : > { %221 = vst [vmem:[%s967_s30 + $0xc8] sm:$0xff] %v220_v25  ;;  %223 = vst [vmem:[%s967_s30 + $0xd0] sm:$0xff] %v222_v26  ;;  %v230_v30 = vld [vmem:[%s959_s29 + $0x1d0] sm:$0xff]  ;;  %v232_v31 = vld [vmem:[%s959_s29 + $0x1d8] sm:$0xff] }
  0x23   : > { %225 = vst [vmem:[%s967_s30 + $0xd8] sm:$0xff] %v224_v27  ;;  %227 = vst [vmem:[%s967_s30 + $0xe0] sm:$0xff] %v226_v28  ;;  %v234_v32 = vld [vmem:[%s959_s29 + $0x200] sm:$0xff]  ;;  %v236_v33 = vld [vmem:[%s959_s29 + $0x208] sm:$0xff] }
  0x24   : > { %229 = vst [vmem:[%s967_s30 + $0xe8] sm:$0xff] %v228_v29  ;;  %231 = vst [vmem:[%s967_s30 + $0xf0] sm:$0xff] %v230_v30  ;;  %v238_v34 = vld [vmem:[%s959_s29 + $0x210] sm:$0xff]  ;;  %v240_v35 = vld [vmem:[%s959_s29 + $0x218] sm:$0xff] }
  0x25   : > { %233 = vst [vmem:[%s967_s30 + $0xf8] sm:$0xff] %v232_v31  ;;  %235 = vst [vmem:[%s967_s30 + $0x100] sm:$0xff] %v234_v32  ;;  %v242_v36 = vld [vmem:[%s959_s29 + $0x240] sm:$0xff]  ;;  %v244_v37 = vld [vmem:[%s959_s29 + $0x248] sm:$0xff] }
  0x26   : > { %237 = vst [vmem:[%s967_s30 + $0x108] sm:$0xff] %v236_v33  ;;  %239 = vst [vmem:[%s967_s30 + $0x110] sm:$0xff] %v238_v34  ;;  %v246_v38 = vld [vmem:[%s959_s29 + $0x250] sm:$0xff]  ;;  %v248_v39 = vld [vmem:[%s959_s29 + $0x258] sm:$0xff] }
  0x27   : > { %241 = vst [vmem:[%s967_s30 + $0x118] sm:$0xff] %v240_v35  ;;  %243 = vst [vmem:[%s967_s30 + $0x120] sm:$0xff] %v242_v36  ;;  %v250_v40 = vld [vmem:[%s959_s29 + $0x280] sm:$0xff]  ;;  %v252_v41 = vld [vmem:[%s959_s29 + $0x288] sm:$0xff] }
  0x28   : > { %245 = vst [vmem:[%s967_s30 + $0x128] sm:$0xff] %v244_v37  ;;  %247 = vst [vmem:[%s967_s30 + $0x130] sm:$0xff] %v246_v38  ;;  %v254_v42 = vld [vmem:[%s959_s29 + $0x290] sm:$0xff]  ;;  %v256_v43 = vld [vmem:[%s959_s29 + $0x298] sm:$0xff] }
  0x29   : > { %249 = vst [vmem:[%s967_s30 + $0x138] sm:$0xff] %v248_v39  ;;  %251 = vst [vmem:[%s967_s30 + $0x140] sm:$0xff] %v250_v40  ;;  %v258_v44 = vld [vmem:[%s959_s29 + $0x2c0] sm:$0xff]  ;;  %v260_v45 = vld [vmem:[%s959_s29 + $0x2c8] sm:$0xff] }
  0x2a   : > { %253 = vst [vmem:[%s967_s30 + $0x148] sm:$0xff] %v252_v41  ;;  %255 = vst [vmem:[%s967_s30 + $0x150] sm:$0xff] %v254_v42  ;;  %v262_v46 = vld [vmem:[%s959_s29 + $0x2d0] sm:$0xff]  ;;  %v264_v47 = vld [vmem:[%s959_s29 + $0x2d8] sm:$0xff] }
  0x2b   : > { %257 = vst [vmem:[%s967_s30 + $0x158] sm:$0xff] %v256_v43  ;;  %259 = vst [vmem:[%s967_s30 + $0x160] sm:$0xff] %v258_v44  ;;  %v266_v48 = vld [vmem:[%s959_s29 + $0x300] sm:$0xff]  ;;  %v268_v49 = vld [vmem:[%s959_s29 + $0x308] sm:$0xff] }
  0x2c   : > { %261 = vst [vmem:[%s967_s30 + $0x168] sm:$0xff] %v260_v45  ;;  %263 = vst [vmem:[%s967_s30 + $0x170] sm:$0xff] %v262_v46  ;;  %v270_v50 = vld [vmem:[%s959_s29 + $0x310] sm:$0xff]  ;;  %v272_v51 = vld [vmem:[%s959_s29 + $0x318] sm:$0xff] }
  0x2d   : > { %265 = vst [vmem:[%s967_s30 + $0x178] sm:$0xff] %v264_v47  ;;  %267 = vst [vmem:[%s967_s30 + $0x180] sm:$0xff] %v266_v48 }
  0x2e   : > { %269 = vst [vmem:[%s967_s30 + $0x188] sm:$0xff] %v268_v49  ;;  %271 = vst [vmem:[%s967_s30 + $0x190] sm:$0xff] %v270_v50 }
  0x2f   : > { %273 = vst [vmem:[%s967_s30 + $0x198] sm:$0xff] %v272_v51 }
  0x30 PF: > { %p772_p7 = scmp.ge.s32.totalorder %s889_s17, 1  ;;  %p278_p8 = scmp.lt.s32.totalorder %s889_s17, 3 }
  0x32   : > { %p279_p9 = pnand %p772_p7, %p278_p8 }
  0x33   : > { %s285_s5 = sand.u32 (!%p279_p9), 1, %s881_s15   ;;  %v891_v52 = vmov (!%p279_p9), 0.0   ;;  %vm376_vm0 = vcmask (!%p279_p9), 1043456   ;;  %vm366_vm1 = vcmask (!%p279_p9), 818176   ;;  %p783_p10 = scmp.ne.s32.totalorder (!%p279_p9), %s934_s18, 0 }
  0x34   : > { %282 = sbr.rel (%p279_p9) target bundleno = 470 (0x1d6), region = 47  ;;  %453 = vmatprep.mubr.f32.mxu0 (!%p279_p9), %v891_v52  ;;  %536 = vmatprep.mubr.f32.mxu1 (!%p279_p9), %v891_v52 }
  0x35   : > { %s839_s6 = smul.u32 (!%p279_p9), 416, %s285_s5 }
  0x36   : > { %s840_s14 = smul.u32 (!%p279_p9), 96, %s285_s5 }
  0x37   : > { %s1074_s7 = scalar_lea.vmem (!%p279_p9), [#allocation2], %s839_s6 }
  0x38   : > { %v315_v53 = vld [vmem:[%s1074_s7 + $0x8] sm:$0xff] (!%p279_p9)  ;;  %v317_v55 = vld [vmem:[%s1074_s7 + $0x18] sm:$0xff] (!%p279_p9)  ;;  %v314_v58 = vld [vmem:[%s1074_s7] sm:$0xff] (!%p279_p9)  ;;  %s1147_s17 = scalar_lea.vmem (!%p279_p9), [#allocation3], %s840_s14 }
  0x39   : > { %v319_v54 = vld [vmem:[%s1074_s7 + $0x28] sm:$0xff] (!%p279_p9)  ;;  %v321_v57 = vld [vmem:[%s1074_s7 + $0x38] sm:$0xff] (!%p279_p9)  ;;  %v318_v59 = vld [vmem:[%s1074_s7 + $0x20] sm:$0xff] (!%p279_p9) }
  0x3a   : > { %v790_v56 = vpack.c.bf16 (!%p279_p9), %v319_v54, %v315_v53  ;;  %v814_v60 = vpack.c.bf16 (!%p279_p9), %v321_v57, %v317_v55  ;;  %v792_v61 = vpack.c.bf16 (!%p279_p9), %v318_v59, %v314_v58  ;;  %v316_v62 = vld [vmem:[%s1074_s7 + $0x10] sm:$0xff] (!%p279_p9)  ;;  %v323_v0 = vld [vmem:[%s1074_s7 + $0x48] sm:$0xff] (!%p279_p9)  ;;  %v325_v3 = vld [vmem:[%s1074_s7 + $0x58] sm:$0xff] (!%p279_p9) }
  0x3b   : > { %v320_v63 = vld [vmem:[%s1074_s7 + $0x30] sm:$0xff]  ;;  %v327_v2 = vld [vmem:[%s1074_s7 + $0x68] sm:$0xff]  ;;  %v329_v4 = vld [vmem:[%s1074_s7 + $0x78] sm:$0xff]  ;;  %vm571_vm2 = vcmask (!%p783_p10), 7168   ;;  %vm574_vm3 = vcmask (!%p783_p10), 3072  }
  0x3c   : > { %791 = vmatprep.subr.bf16.mxu0 %v790_v56  ;;  %v816_v1 = vpack.c.bf16 %v320_v63, %v316_v62  ;;  %815 = vmatprep.subr.bf16.mxu1 %v814_v60  ;;  %v794_v5 = vpack.c.bf16 %v327_v2, %v323_v0  ;;  %v818_v6 = vpack.c.bf16 %v329_v4, %v325_v3  ;;  %v322_v7 = vld [vmem:[%s1074_s7 + $0x40] sm:$0xff]  ;;  %v324_v9 = vld [vmem:[%s1074_s7 + $0x50] sm:$0xff]  ;;  %v331_v12 = vld [vmem:[%s1074_s7 + $0x88] sm:$0xff] }
  0x3d   : > { %793 = vmatpush1.bf16.msra.mxu0 %v792_v61  ;;  %v326_v8 = vld [vmem:[%s1074_s7 + $0x60] sm:$0xff]  ;;  %v328_v11 = vld [vmem:[%s1074_s7 + $0x70] sm:$0xff]  ;;  %v335_v13 = vld [vmem:[%s1074_s7 + $0xa8] sm:$0xff] }
  0x3e   : > { %817 = vmatpush1.bf16.msra.mxu1 %v816_v1  ;;  %v796_v10 = vpack.c.bf16 %v326_v8, %v322_v7  ;;  %795 = vmatprep.subr.bf16.mxu0 %v794_v5  ;;  %v820_v14 = vpack.c.bf16 %v328_v11, %v324_v9  ;;  %v798_v15 = vpack.c.bf16 %v335_v13, %v331_v12  ;;  %v333_v16 = vld [vmem:[%s1074_s7 + $0x98] sm:$0xff]  ;;  %v330_v18 = vld [vmem:[%s1074_s7 + $0x80] sm:$0xff]  ;;  %v332_v21 = vld [vmem:[%s1074_s7 + $0x90] sm:$0xff] }
  0x3f   : > { %819 = vmatprep.subr.bf16.mxu1 %v818_v6  ;;  %v337_v17 = vld [vmem:[%s1074_s7 + $0xb8] sm:$0xff]  ;;  %v334_v20 = vld [vmem:[%s1074_s7 + $0xa0] sm:$0xff]  ;;  %v336_v22 = vld [vmem:[%s1074_s7 + $0xb0] sm:$0xff] }
  0x40   : > { %v822_v19 = vpack.c.bf16 %v337_v17, %v333_v16  ;;  %v800_v23 = vpack.c.bf16 %v334_v20, %v330_v18  ;;  %v339_v24 = vld [vmem:[%s1074_s7 + $0xc8] sm:$0xff]  ;;  %v341_v26 = vld [vmem:[%s1074_s7 + $0xd8] sm:$0xff]  ;;  %v824_v27 = vpack.c.bf16 %v336_v22, %v332_v21  ;;  %v338_v30 = vld [vmem:[%s1074_s7 + $0xc0] sm:$0xff]  ;;  %v892_v16 = vmov (!%p783_p10), 0.0  }
  0x41   : > { %797 = vmatpush1.bf16.msra.mxu0 %v796_v10  ;;  %v343_v25 = vld [vmem:[%s1074_s7 + $0xe8] sm:$0xff]  ;;  %v345_v29 = vld [vmem:[%s1074_s7 + $0xf8] sm:$0xff]  ;;  %v342_v31 = vld [vmem:[%s1074_s7 + $0xe0] sm:$0xff]  ;;  %572 = vst.msk [vmem:[%s1261_s3] sm:$0xff] (!%p783_p10), %vm571_vm2, %v892_v16 }
  0x42   : > { %821 = vmatpush1.bf16.msra.mxu1 %v820_v14  ;;  %799 = vmatprep.subr.bf16.mxu0 %v798_v15  ;;  %v802_v28 = vpack.c.bf16 %v343_v25, %v339_v24  ;;  %v826_v32 = vpack.c.bf16 %v345_v29, %v341_v26  ;;  %v340_v33 = vld [vmem:[%s1074_s7 + $0xd0] sm:$0xff]  ;;  %v347_v35 = vld [vmem:[%s1074_s7 + $0x108] sm:$0xff]  ;;  %v349_v37 = vld [vmem:[%s1074_s7 + $0x118] sm:$0xff]  ;;  %v804_v39 = vpack.c.bf16 %v342_v31, %v338_v30 }
  0x43   : > { %823 = vmatprep.subr.bf16.mxu1 %v822_v19  ;;  %v344_v34 = vld [vmem:[%s1074_s7 + $0xf0] sm:$0xff]  ;;  %v351_v36 = vld [vmem:[%s1074_s7 + $0x128] sm:$0xff]  ;;  %v353_v38 = vld [vmem:[%s1074_s7 + $0x138] sm:$0xff]  ;;  %573 = vst.msk [vmem:[%s1261_s3 + $0x8] sm:$0xff] (!%p783_p10), %vm571_vm2, %v892_v16 }
  0x44   : > { %v828_v40 = vpack.c.bf16 %v344_v34, %v340_v33  ;;  %v806_v41 = vpack.c.bf16 %v351_v36, %v347_v35  ;;  %v346_v42 = vld [vmem:[%s1074_s7 + $0x100] sm:$0xff]  ;;  %v348_v44 = vld [vmem:[%s1074_s7 + $0x110] sm:$0xff]  ;;  %v830_v45 = vpack.c.bf16 %v353_v38, %v349_v37  ;;  %v355_v47 = vld [vmem:[%s1074_s7 + $0x148] sm:$0xff]  ;;  %576 = vst.msk [vmem:[%s1262_s4] sm:$0xff] (!%p783_p10), %vm571_vm2, %v892_v16 }
  0x45   : > { %801 = vmatpush1.bf16.msra.mxu0 %v800_v23  ;;  %v350_v43 = vld [vmem:[%s1074_s7 + $0x120] sm:$0xff]  ;;  %v352_v46 = vld [vmem:[%s1074_s7 + $0x130] sm:$0xff]  ;;  %v359_v48 = vld [vmem:[%s1074_s7 + $0x168] sm:$0xff]  ;;  %577 = vst.msk [vmem:[%s1262_s4 + $0x8] sm:$0xff] (!%p783_p10), %vm571_vm2, %v892_v16 }
  0x46   : > { %825 = vmatpush1.bf16.msra.mxu1 %v824_v27  ;;  %803 = vmatprep.subr.bf16.mxu0 %v802_v28  ;;  %v357_v49 = vld [vmem:[%s1074_s7 + $0x158] sm:$0xff]  ;;  %v808_v51 = vpack.c.bf16 %v350_v43, %v346_v42  ;;  %v832_v53 = vpack.c.bf16 %v352_v46, %v348_v44  ;;  %v810_v54 = vpack.c.bf16 %v359_v48, %v355_v47  ;;  %v354_v55 = vld [vmem:[%s1074_s7 + $0x140] sm:$0xff]  ;;  %v356_v58 = vld [vmem:[%s1074_s7 + $0x150] sm:$0xff] }
  0x47   : > { %827 = vmatprep.subr.bf16.mxu1 %v826_v32  ;;  %v361_v50 = vld [vmem:[%s1074_s7 + $0x178] sm:$0xff]  ;;  %v358_v56 = vld [vmem:[%s1074_s7 + $0x160] sm:$0xff]  ;;  %v360_v59 = vld [vmem:[%s1074_s7 + $0x170] sm:$0xff]  ;;  %575 = vst.msk [vmem:[%s1261_s3 + $0x10] sm:$0xf] (!%p783_p10), %vm574_vm3, %v892_v16 }
  0x48   : > { %v834_v57 = vpack.c.bf16 %v361_v50, %v357_v49  ;;  %v812_v60 = vpack.c.bf16 %v358_v56, %v354_v55  ;;  %v836_v61 = vpack.c.bf16 %v360_v59, %v356_v58  ;;  %v363_v62 = vld [vmem:[%s1074_s7 + $0x188] sm:$0xf]  ;;  %v365_v63 = vld [vmem:[%s1074_s7 + $0x198] sm:$0xf]  ;;  %v362_v0 = vld [vmem:[%s1074_s7 + $0x180] sm:$0xf] }
  0x49   : > { %805 = vmatpush1.bf16.msra.mxu0 %v804_v39  ;;  %v364_v1 = vld [vmem:[%s1074_s7 + $0x190] sm:$0xf]  ;;  %v311_v2 = vld [vmem:[%s1259_s1] sm:$0xff]  ;;  %v312_v3 = vld [vmem:[%s1259_s1 + $0x8] sm:$0xff]  ;;  %578 = vst.msk [vmem:[%s1262_s4 + $0x10] sm:$0xf] (!%p783_p10), %vm574_vm3, %v892_v16 }
  0x4a   : > { %829 = vmatpush1.bf16.msra.mxu1 %v828_v40  ;;  %807 = vmatprep.subr.bf16.mxu0 %v806_v41  ;;  %v313_v4 = vld [vmem:[%s1259_s1 + $0x10] sm:$0xf] }
  0x4b   : > { %831 = vmatprep.subr.bf16.mxu1 %v830_v45 }
  0x4d   : > { %809 = vmatpush1.bf16.msra.mxu0 %v808_v51 }
  0x4e   : > { %833 = vmatpush1.bf16.msra.mxu1 %v832_v53  ;;  %811 = vmatprep.subr.bf16.mxu0 %v810_v54 }
  0x4f   : > { %835 = vmatprep.subr.bf16.mxu1 %v834_v57 }
  0x51   : > { %813 = vmatpush1.bf16.msra.mxu0 %v812_v60 }
  0x52   : > { %837 = vmatpush1.bf16.msra.mxu1 %v836_v61  ;;  %773 = vmatprep.subr.msk.mxu0 %vm376_vm0, %v363_v62 }
  0x53   : > { %778 = vmatprep.subr.msk.mxu1 %vm376_vm0, %v365_v63 }
  0x55   : > { %774 = vmatpush1.msk.msra.mxu0 %vm376_vm0, %v362_v0 }
  0x56   : > { %779 = vmatpush1.msk.msra.mxu1 %vm376_vm0, %v364_v1  ;;  %775 = vmatmul.mubr.msk.f32.vlgmr.msra.gmra.mrb[0].mxu0 %vm366_vm1, %v311_v2 }
  0x57   : > { %780 = vmatmul.mubr.msk.f32.vlgmr.msra.gmra.mrb[0].mxu1 %vm366_vm1, %v311_v2  ;;  %459 = vmatprep.mubr.f32.mxu0 %v891_v52 }
  0x58   : > { %542 = vmatprep.mubr.f32.mxu1 %v891_v52 }
  0x5a   : > { %776 = vmatmul.mubr.msk.f32.gmra.mrb[2].mxu0 %vm366_vm1, %v312_v3 }
  0x5b   : > { %781 = vmatmul.mubr.msk.f32.gmra.mrb[2].mxu1 %vm366_vm1, %v312_v3  ;;  %465 = vmatprep.mubr.f32.mxu0 %v891_v52 }
  0x5c   : > { %548 = vmatprep.mubr.f32.mxu1 %v891_v52 }
  0x5e   : > { %777 = vmatmul.mubr.msk.f32.gmra.mrb[4].mxu0 %vm366_vm1, %v313_v4 }
  0x5f   : > { %782 = vmatmul.mubr.msk.f32.gmra.mrb[4].mxu1 %vm366_vm1, %v313_v4 }
 0x129   : > { %v455_v5 = vpop.f32.mrb[0].mxu0 }
 0x12a   : > { %555 = vst [vmem:[%s1147_s17] sm:$0xff] %v455_v5  ;;  %v538_v6 = vpop.f32.mrb[0].mxu1  ;;  %v457_v7 = vpop.f32.mrb[1].mxu0 }
 0x12b   : > { %557 = vst [vmem:[%s1147_s17 + $0x10] sm:$0xff] %v538_v6  ;;  %556 = vst [vmem:[%s1147_s17 + $0x8] sm:$0xff] %v457_v7  ;;  %v540_v52 = vpop.f32.mrb[1].mxu1 }
 0x12c   : > { %558 = vst [vmem:[%s1147_s17 + $0x18] sm:$0xff] %v540_v52 }
 0x12d   : > { %v461_v8 = vpop.f32.mrb[2].mxu0 }
 0x12e   : > { %559 = vst [vmem:[%s1147_s17 + $0x20] sm:$0xff] %v461_v8  ;;  %v544_v9 = vpop.f32.mrb[2].mxu1  ;;  %v463_v10 = vpop.f32.mrb[3].mxu0  ;;  %570 = sbr.rel (%p783_p10) target bundleno = 309 (0x135), region = 55 }
 0x12f   : > { %561 = vst [vmem:[%s1147_s17 + $0x30] sm:$0xff] %v544_v9  ;;  %560 = vst [vmem:[%s1147_s17 + $0x28] sm:$0xff] %v463_v10  ;;  %v546_v11 = vpop.f32.mrb[3].mxu1 }
 0x130   : > { %562 = vst [vmem:[%s1147_s17 + $0x38] sm:$0xff] %v546_v11 }
 0x131   : > { %v467_v12 = vpop.f32.mrb[4].mxu0 }
 0x132   : > { %563 = vst [vmem:[%s1147_s17 + $0x40] sm:$0xf] %v467_v12  ;;  %v550_v13 = vpop.f32.mrb[4].mxu1  ;;  %v469_v14 = vpop.f32.mrb[5].mxu0 }
 0x133   : > { %565 = vst [vmem:[%s1147_s17 + $0x50] sm:$0xf] %v550_v13  ;;  %564 = vst [vmem:[%s1147_s17 + $0x48] sm:$0xf] %v469_v14  ;;  %v552_v15 = vpop.f32.mrb[5].mxu1 }
 0x134   : > { %566 = vst [vmem:[%s1147_s17 + $0x58] sm:$0xf] %v552_v15 }
 0x135 PF: > { %v592_v17 = vsel %vm376_vm0, %v467_v12, 0.0  ;;  %v593_v18 = vsel %vm376_vm0, %v469_v14, 0.0  ;;  %v595_v19 = vsel %vm376_vm0, %v550_v13, 0.0  ;;  %v597_v20 = vsel %vm376_vm0, %v552_v15, 0.0  ;;  %v581_v56 = vld [vmem:[%s1261_s3 + $0x10] sm:$0xf] }
 0x136   : > { %v594_v21 = vadd.f32 %v593_v18, %v592_v17  ;;  %v582_v22 = vadd.f32 %v457_v7, %v455_v5  ;;  %v612_v23 = vmul.f32 %v455_v5, %v455_v5  ;;  %v613_v24 = vmul.f32 %v457_v7, %v457_v7  ;;  %v579_v57 = vld [vmem:[%s1261_s3] sm:$0xff]  ;;  %v580_v63 = vld [vmem:[%s1261_s3 + $0x8] sm:$0xff]  ;;  %v611_v4 = vld [vmem:[%s1262_s4 + $0x10] sm:$0xf]  ;;  %s789_s11 = sshll.u32 (%p949_p5), %s934_s18, 5 }
 0x137   : > { %v614_v25 = vmul.f32 %v538_v6, %v538_v6  ;;  %v615_v26 = vmul.f32 %v540_v52, %v540_v52  ;;  %v587_v27 = vadd.f32 %v463_v10, %v461_v8  ;;  %v620_v28 = vmul.f32 %v467_v12, %v467_v12  ;;  %v609_v62 = vld [vmem:[%s1262_s4] sm:$0xff]  ;;  %v610_v5 = vld [vmem:[%s1262_s4 + $0x8] sm:$0xff]  ;;  %s658_s14 = scalar_lea.vmem (%p949_p5), %s1260_s2, %s789_s11  ;;  %v677_v12 = vld [vmem:[%s1147_s17 + $0x18] sm:$0xff] (%p949_p5) }
 0x138   : > { %v596_v29 = vadd.f32 %v595_v19, %v594_v21  ;;  %v583_v30 = vadd.f32 %v582_v22, %v538_v6  ;;  %v624_v31 = vadd.f32 %v613_v24, %v612_v23  ;;  %v621_v32 = vmul.f32 %v469_v14, %v469_v14  ;;  %v681_v14 = vld [vmem:[%s1147_s17 + $0x28] sm:$0xff] (%p949_p5)  ;;  %678 = vst [vmem:[%s658_s14 + $0x18] sm:$0xff] (%p949_p5), %v677_v12  ;;  %v685_v16 = vld [vmem:[%s1147_s17 + $0x38] sm:$0xff] (%p949_p5) }
 0x139   : > { %v588_v33 = vadd.f32 %v587_v27, %v544_v9  ;;  %v622_v34 = vmul.f32 %v550_v13, %v550_v13  ;;  %v623_v35 = vmul.f32 %v552_v15, %v552_v15  ;;  %v634_v36 = vsel %vm376_vm0, %v620_v28, 0.0  ;;  %v679_v13 = vld [vmem:[%s1147_s17 + $0x20] sm:$0xff] (%p949_p5)  ;;  %682 = vst [vmem:[%s658_s14 + $0x48] sm:$0xff] (%p949_p5), %v681_v14  ;;  %v683_v15 = vld [vmem:[%s1147_s17 + $0x30] sm:$0xff] (%p949_p5)  ;;  %686 = vst [vmem:[%s658_s14 + $0x58] sm:$0xff] (%p949_p5), %v685_v16 }
 0x13a   : > { %v598_v37 = vadd.f32 %v597_v20, %v596_v29  ;;  %v584_v38 = vadd.f32 %v583_v30, %v540_v52  ;;  %v625_v39 = vadd.f32 %v624_v31, %v614_v25  ;;  %v635_v40 = vsel %vm376_vm0, %v621_v32, 0.0  ;;  %680 = vst [vmem:[%s658_s14 + $0x40] sm:$0xff] (%p949_p5), %v679_v13  ;;  %v687_v17 = vld [vmem:[%s1147_s17 + $0x40] sm:$0xff] (%p949_p5)  ;;  %684 = vst [vmem:[%s658_s14 + $0x50] sm:$0xff] (%p949_p5), %v683_v15  ;;  %v689_v18 = vld [vmem:[%s1147_s17 + $0x48] sm:$0xff] (%p949_p5) }
 0x13b   : > { %v589_v41 = vadd.f32 %v588_v33, %v546_v11  ;;  %v636_v42 = vadd.f32 %v635_v40, %v634_v36  ;;  %v637_v43 = vsel %vm376_vm0, %v622_v34, 0.0  ;;  %v616_v45 = vmul.f32 %v461_v8, %v461_v8  ;;  %688 = vst [vmem:[%s658_s14 + $0x80] sm:$0xff] (%p949_p5), %v687_v17  ;;  %v691_v19 = vld [vmem:[%s1147_s17 + $0x50] sm:$0xff] (%p949_p5)  ;;  %v693_v20 = vld [vmem:[%s1147_s17 + $0x58] sm:$0xff] (%p949_p5)  ;;  %690 = vst [vmem:[%s658_s14 + $0x88] sm:$0xff] (%p949_p5), %v689_v18 }
 0x13c   : > { %599 = vadd.xlane.f32.xlu1 %v598_v37  ;;  %585 = vadd.xlane.f32.xlu0 %v584_v38  ;;  %v626_v44 = vadd.f32 %v625_v39, %v615_v26  ;;  %v617_v46 = vmul.f32 %v463_v10, %v463_v10  ;;  %v639_v48 = vsel %vm376_vm0, %v623_v35, 0.0  ;;  %v618_v49 = vmul.f32 %v544_v9, %v544_v9  ;;  %v671_v9 = vld [vmem:[%s1147_s17] sm:$0xff] (%p949_p5)  ;;  %v673_v10 = vld [vmem:[%s1147_s17 + $0x8] sm:$0xff] (%p949_p5) }
 0x13d   : > { %v638_v47 = vadd.f32 %v637_v43, %v636_v42  ;;  %v619_v50 = vmul.f32 %v546_v11, %v546_v11  ;;  %vm607_vm4 = vcmask 3072   ;;  %vm604_vm5 = vcmask 7168   ;;  %v675_v11 = vld [vmem:[%s1147_s17 + $0x10] sm:$0xff] (%p949_p5)  ;;  %672 = vst [vmem:[%s658_s14] sm:$0xff] (%p949_p5), %v671_v9  ;;  %674 = vst [vmem:[%s658_s14 + $0x8] sm:$0xff] (%p949_p5), %v673_v10 }
 0x13e   : > { %v629_v51 = vadd.f32 %v617_v46, %v616_v45  ;;  %676 = vst [vmem:[%s658_s14 + $0x10] sm:$0xff] (%p949_p5), %v675_v11  ;;  %692 = vst [vmem:[%s658_s14 + $0x90] sm:$0xff] (%p949_p5), %v691_v19 }
 0x13f   : > { %v640_v53 = vadd.f32 %v639_v48, %v638_v47  ;;  %694 = vst [vmem:[%s658_s14 + $0x98] sm:$0xff] (%p949_p5), %v693_v20 }
 0x140   : > { %627 = vadd.xlane.f32.xlu1 %v626_v44  ;;  %590 = vadd.xlane.f32.xlu0 %v589_v41  ;;  %v630_v54 = vadd.f32 %v629_v51, %v618_v49 }
 0x142   : > { %v631_v55 = vadd.f32 %v630_v54, %v619_v50 }
 0x144   : > { %641 = vadd.xlane.f32.xlu1 %v640_v53  ;;  %632 = vadd.xlane.f32.xlu0 %v631_v55 }
 0x1c9   : > { %v600_v58 = vpop.xlane.xlu1 %599  ;;  %v586_v59 = vpop.xlane.xlu0 %585 }
 0x1ca   : > { %v603_v60 = vadd.f32 %v600_v58, %v581_v56  ;;  %v601_v61 = vadd.f32 %v586_v59, %v579_v57 }
 0x1cc   : > { %608 = vst.msk [vmem:[%s1261_s3 + $0x10] sm:$0xf] %vm607_vm4, %v603_v60 }
 0x1cd   : > { %605 = vst.msk [vmem:[%s1261_s3] sm:$0xff] %vm604_vm5, %v601_v61  ;;  %v628_v0 = vpop.xlane.xlu1 %627  ;;  %v591_v1 = vpop.xlane.xlu0 %590 }
 0x1ce   : > { %v643_v2 = vadd.f32 %v628_v0, %v609_v62  ;;  %v602_v3 = vadd.f32 %v591_v1, %v580_v63 }
 0x1cf   : > { %655 = sbr.rel (!%p949_p5) target bundleno = 470 (0x1d6), region = 59 }
 0x1d0   : > { %646 = vst.msk [vmem:[%s1262_s4] sm:$0xff] %vm604_vm5, %v643_v2  ;;  %606 = vst.msk [vmem:[%s1261_s3 + $0x8] sm:$0xff] %vm604_vm5, %v602_v3 }
 0x1d1   : > { %v642_v6 = vpop.xlane.xlu1 %641  ;;  %v633_v7 = vpop.xlane.xlu0 %632 }
 0x1d2   : > { %v645_v52 = vadd.f32 %v642_v6, %v611_v4  ;;  %v644_v8 = vadd.f32 %v633_v7, %v610_v5 }
 0x1d4   : > { %648 = vst.msk [vmem:[%s1262_s4 + $0x10] sm:$0xf] %vm607_vm4, %v645_v52 }
 0x1d5   : > { %647 = vst.msk [vmem:[%s1262_s4 + $0x8] sm:$0xff] %vm604_vm5, %v644_v8 }
 0x1d6 PF: > { %p12_p11 = scmp.ge.s32.totalorder %s937_s19, 4   ;;  %s1264_s15 = smov %s885_s16 }
 0x1d7   : > { %s1265_s16 = smov %s947_s22  ;;  %s1266_s17 = smov %s937_s19 }
 0x1d8   :  { %14 = sbr.rel (!%p12_p11) target bundleno = 2 (0x2), region = 129 }

</bundles_post_ra>
